<compile_context>
chip_gen: v7x
topology: tpu7x:2x2x1
jax: 0.10.0
libtpu: 0.0.40
codegen_flags: <defaults>
</compile_context>

<pallas_src>
import jax
import jax.numpy as jnp
from jax.experimental import pallas as pl
from jax.experimental.pallas import tpu as pltpu


def _round_up(x: int, m: int) -> int:
    return ((x + m - 1) // m) * m


# ----------------------------- kernels -------------------------------------

def _linear_kernel_f32(x_ref, w_ref, b_ref, o_ref):
    """f32 output path: accumulate directly into the output tile.

    x_ref: (tm, tk)  w_ref: (tk, tn)  b_ref: (1, tn) f32  o_ref: (tm, tn) f32
    """
    k = pl.program_id(2)
    part = jnp.dot(x_ref[...], w_ref[...], preferred_element_type=jnp.float32)

    @pl.when(k == 0)
    def _():
        o_ref[...] = part + b_ref[...]          # init + bias in one store

    @pl.when(k != 0)
    def _():
        o_ref[...] += part


def _linear_kernel_acc(x_ref, w_ref, b_ref, o_ref, acc_ref):
    """Non-f32 output path: f32 VMEM accumulator, cast on the last K step."""
    k = pl.program_id(2)
    part = jnp.dot(x_ref[...], w_ref[...], preferred_element_type=jnp.float32)

    @pl.when(k == 0)
    def _():
        acc_ref[...] = part

    @pl.when(k != 0)
    def _():
        acc_ref[...] += part

    @pl.when(k == pl.num_programs(2) - 1)
    def _():
        o_ref[...] = (acc_ref[...] + b_ref[...]).astype(o_ref.dtype)


# ----------------------------- tiling --------------------------------------

# Caps chosen so the double-buffered f32 working set (~7.5 MiB at the caps)
# fits v5e's 16 MiB scoped-VMEM default; v6e/v7x have ample headroom.
_TM_CAP = 256     # rows per tile (sublane axis)
_TN_CAP = 512     # output cols per tile (lane-dense when >= 128)
_TK_CAP = 1024    # reduction depth per K step


# ----------------------------- forward -------------------------------------

def make_lower_model_classification(weight, bias):
    """One-time parameter prep + jitted forward implementing F.linear(x, W, b).

    weight: (n_output, n_feature) in PyTorch layout; bias: (n_output,).
    """
    weight = jnp.asarray(weight)
    bias = jnp.asarray(bias)
    n_output, n_feature = weight.shape

    # K tile depth depends only on n_feature.
    tk = n_feature if n_feature <= _TK_CAP else _TK_CAP
    f_pad = _round_up(n_feature, tk)

    # Hoisted, once-per-model weight prep: transpose to (F, O) for the
    # canonical MXU contraction, pad only the K axis, bias -> (1, O) f32.
    w_t = weight.T                                   # (F, O)
    if f_pad != n_feature:
        w_t = jnp.pad(w_t, ((0, f_pad - n_feature), (0, 0)))
    w_t = jax.device_put(w_t)
    b2 = jax.device_put(bias.astype(jnp.float32).reshape(1, n_output))

    @jax.jit
    def forward(x):
        B, F = x.shape
        assert F == n_feature, "feature dim mismatch"

        tm = B if B < _TM_CAP else _TM_CAP
        tn = n_output if n_output < _TN_CAP else _TN_CAP

        # Only the reduction (K) axis ever needs zero padding; B/O edge blocks
        # are handled by cdiv grids + Pallas masking (garbage rows/cols never
        # reach the returned output).
        x_p = x if f_pad == F else jnp.pad(x, ((0, 0), (0, f_pad - F)))

        grid = (pl.cdiv(B, tm), pl.cdiv(n_output, tn), f_pad // tk)

        in_specs = [
            pl.BlockSpec((tm, tk), lambda i, j, k: (i, k)),   # x
            pl.BlockSpec((tk, tn), lambda i, j, k: (k, j)),   # weight (F, O)
            pl.BlockSpec((1, tn), lambda i, j, k: (0, j)),    # bias
        ]
        out_spec = pl.BlockSpec((tm, tn), lambda i, j, k: (i, j))
        cparams = pltpu.CompilerParams(
            dimension_semantics=("parallel", "parallel", "arbitrary"))

        if x.dtype == jnp.float32:
            return pl.pallas_call(
                _linear_kernel_f32,
                out_shape=jax.ShapeDtypeStruct((B, n_output), jnp.float32),
                grid_spec=pltpu.PrefetchScalarGridSpec(
                    num_scalar_prefetch=0, grid=grid,
                    in_specs=in_specs, out_specs=out_spec),
                compiler_params=cparams,
            )(x_p, w_t, b2)
        else:
            # e.g. bf16 activations on v6e/v7x: f32 accumulation + f32 epilogue.
            return pl.pallas_call(
                _linear_kernel_acc,
                out_shape=jax.ShapeDtypeStruct((B, n_output), x.dtype),
                grid_spec=pltpu.PrefetchScalarGridSpec(
                    num_scalar_prefetch=0, grid=grid,
                    in_specs=in_specs, out_specs=out_spec,
                    scratch_shapes=[pltpu.VMEM((tm, tn), jnp.float32)]),
                compiler_params=cparams,
            )(x_p, w_t, b2)

    return forward


def init_params(key, n_feature, n_output, dtype=jnp.float32):
    """Deterministic init matching nn.Linear: U(-1/sqrt(fan_in), 1/sqrt(fan_in))."""
    kw, kb = jax.random.split(key)
    bound = 1.0 / (n_feature ** 0.5)
    weight = jax.random.uniform(kw, (n_output, n_feature), dtype,
                                minval=-bound, maxval=bound)
    bias = jax.random.uniform(kb, (n_output,), dtype,
                              minval=-bound, maxval=bound)
    return weight, bias


if __name__ == "__main__":
    key = jax.random.PRNGKey(0)
    k_x, k_p = jax.random.split(key)

    batch, n_feature, n_output = 8, 32, 16
    x = jax.random.normal(k_x, (batch, n_feature), dtype=jnp.float32)
    weight, bias = init_params(k_p, n_feature, n_output)

    forward = make_lower_model_classification(weight, bias)
    out = jax.block_until_ready(forward(x))

    # sanity check vs. plain-JAX reference of F.linear
    ref = x @ weight.T + bias
    assert out.shape == (batch, n_output)
    assert jnp.allclose(out, ref, atol=1e-5, rtol=1e-5)

    print("KERNEL_OK")
</pallas_src>

<mosaic_0001>
module attributes {stable_mosaic.version = 11 : i64} {
  func.func @_linear_kernel_f32(%arg0: i32, %arg1: i32, %arg2: i32, %arg3: memref<8x32xf32, #tpu.memory_space<vmem>>, %arg4: memref<32x16xf32, #tpu.memory_space<vmem>>, %arg5: memref<1x16xf32, #tpu.memory_space<vmem>>, %arg6: memref<8x16xf32, #tpu.memory_space<vmem>>) attributes {dimension_semantics = [#tpu.dimension_semantics<parallel>, #tpu.dimension_semantics<parallel>, #tpu.dimension_semantics<arbitrary>], iteration_bounds = array<i64: 1, 1, 1>, scalar_prefetch = 0 : i64, scratch_operands = 0 : i64, tpu.core_type = #tpu.core_type<tc>, window_params = [{transform_indices = @transform_0, window_bounds = array<i64: 8, 32>}, {transform_indices = @transform_1, window_bounds = array<i64: 32, 16>}, {transform_indices = @transform_2, window_bounds = array<i64: 1, 16>}, {transform_indices = @transform_3, window_bounds = array<i64: 8, 16>}]} {
    %c0 = arith.constant 0 : index
    %c0_0 = arith.constant 0 : index
    %0 = vector.load %arg3[%c0, %c0_0] : memref<8x32xf32, #tpu.memory_space<vmem>>, vector<8x32xf32>
    %c0_1 = arith.constant 0 : index
    %c0_2 = arith.constant 0 : index
    %1 = vector.load %arg4[%c0_1, %c0_2] : memref<32x16xf32, #tpu.memory_space<vmem>>, vector<32x16xf32>
    %cst = arith.constant dense<0.000000e+00> : vector<8x16xf32>
    %2 = tpu.matmul %0, %1, %cst {dimension_numbers = #tpu.dot_dimension_numbers<[1], [0], [0], [1], [0, 0, 1, 1], [], []>} : vector<8x32xf32>, vector<32x16xf32>, vector<8x16xf32> -> vector<8x16xf32>
    %c0_i32 = arith.constant 0 : i32
    %3 = arith.cmpi eq, %arg2, %c0_i32 : i32
    %4 = arith.extui %3 : i1 to i32
    %c0_i32_3 = arith.constant 0 : i32
    %5 = arith.cmpi ne, %4, %c0_i32_3 : i32
    scf.if %5 {
      %c0_6 = arith.constant 0 : index
      %c0_7 = arith.constant 0 : index
      %9 = vector.load %arg5[%c0_6, %c0_7] : memref<1x16xf32, #tpu.memory_space<vmem>>, vector<1x16xf32>
      %10 = vector.broadcast %9 : vector<1x16xf32> to vector<8x16xf32>
      %11 = arith.addf %2, %10 : vector<8x16xf32>
      %c0_8 = arith.constant 0 : index
      %c0_9 = arith.constant 0 : index
      %12 = vector.load %arg6[%c0_8, %c0_9] : memref<8x16xf32, #tpu.memory_space<vmem>>, vector<8x16xf32>
      tpu.vector_store %arg6[%c0_8, %c0_9], %11 {strides = array<i32>} : memref<8x16xf32, #tpu.memory_space<vmem>>, vector<8x16xf32>,
    } else {
    }
    %c0_i32_4 = arith.constant 0 : i32
    %6 = arith.cmpi ne, %arg2, %c0_i32_4 : i32
    %7 = arith.extui %6 : i1 to i32
    %c0_i32_5 = arith.constant 0 : i32
    %8 = arith.cmpi ne, %7, %c0_i32_5 : i32
    scf.if %8 {
      %c0_6 = arith.constant 0 : index
      %c0_7 = arith.constant 0 : index
      %9 = vector.load %arg6[%c0_6, %c0_7] : memref<8x16xf32, #tpu.memory_space<vmem>>, vector<8x16xf32>
      %10 = arith.addf %9, %2 : vector<8x16xf32>
      %c0_8 = arith.constant 0 : index
      %c0_9 = arith.constant 0 : index
      %11 = vector.load %arg6[%c0_8, %c0_9] : memref<8x16xf32, #tpu.memory_space<vmem>>, vector<8x16xf32>
      tpu.vector_store %arg6[%c0_8, %c0_9], %10 {strides = array<i32>} : memref<8x16xf32, #tpu.memory_space<vmem>>, vector<8x16xf32>,
    } else {
    }
    return
  }
  func.func @transform_0(%arg0: i32, %arg1: i32, %arg2: i32) -> (i32, i32) {
    %c0_i32 = arith.constant 0 : i32
    return %arg0, %arg2 : i32, i32
  }
  func.func @transform_1(%arg0: i32, %arg1: i32, %arg2: i32) -> (i32, i32) {
    %c0_i32 = arith.constant 0 : i32
    return %arg2, %arg1 : i32, i32
  }
  func.func @transform_2(%arg0: i32, %arg1: i32, %arg2: i32) -> (i32, i32) {
    %c0_i32 = arith.constant 0 : i32
    %c0_i32_0 = arith.constant 0 : i32
    return %c0_i32, %arg1 : i32, i32
  }
  func.func @transform_3(%arg0: i32, %arg1: i32, %arg2: i32) -> (i32, i32) {
    %c0_i32 = arith.constant 0 : i32
    return %arg0, %arg1 : i32, i32
  }
}

</mosaic_0001>

<bundles_post_ra>
// kernel: forward.1
= control target key start
LH: loop header
LB: loop body
LE: loop exit
PB: predicated region body
PF: predicated region fallthrough
CT: control target
= control target key end

     0   :  { %8 = vsyncpa [#allocation3], 0  ;;  %s336_s0 = inlined_call_operand.hbm [shape: f32[8,32], index: 0, kind: input, shape index: {}]   ;;  %s337_s1 = inlined_call_operand.hbm [shape: f32[32,16], index: 1, kind: input, shape index: {}]   ;;  %s338_s2 = inlined_call_operand.vmem [shape: f32[1,16], index: 2, kind: input, shape index: {}]   ;;  %s339_s3 = inlined_call_operand.hbm [shape: f32[8,16], index: 3, kind: output, shape index: {}]  }
   0x1   :  { %9 = vsyncpa [#allocation6], 0 }
   0x2   :  { %10 = vsyncpa [#allocation4], 0  ;;  %s262_s12 = smov [#allocation2]   ;;  %s263_s14 = smov [#allocation5]  }
   0x3   :  { %s17_s13 = sshll.u32 %s262_s12, 4  ;;  %s26_s15 = sshll.u32 %s263_s14, 4  ;;  %s18_s13 = int_to_ptr.vmem [resolvable:$true] %s17_s13  ;;  %s290_s15 = int_to_ptr.vmem [resolvable:$true] %s26_s15 }
   0x4   :  { %s190_s18 = scalar_lea.hbm %s336_s0, 128 }
   0x5   :  { %p191_p0 = scmp.ne.s32.totalorder %s336_s0, %s190_s18  ;;  %p194_p1 = scmp.lt.u32.totalorder %s190_s18, %s336_s0 }
   0x7   :  { %p196_p2 = pnand %p194_p1, %p191_p0 }
   0x9   :  { %199 = shalt.err (!%p196_p2)
}
   0xa   :  { %s200_s23 = scalar_lea.vmem %s18_s13, 128  ;;  %p205_p4 = scmp.lt.s32.totalorder %s18_s13, %s18_s13 }
   0xb   :  { %p201_p3 = scmp.ne.s32.totalorder %s18_s13, %s200_s23  ;;  %p206_p5 = scmp.lt.s32.totalorder %s200_s23, %s200_s23 }
   0xd   :  { %p207_p6 = por %p206_p5, %p205_p4 }
   0xf   :  { %p208_p7 = pnand %p207_p6, %p201_p3 }
  0x11   :  { %211 = shalt.err (!%p208_p7)
}
  0x12   :  { %20 = dma.hbm_to_vmem [thread:$0]  %s336_s0, 128, %s18_s13, [#allocation3]  }
  0x13   :  { %s212_s28 = scalar_lea.hbm %s337_s1, 512 }
  0x14   :  { %p213_p8 = scmp.ne.s32.totalorder %s337_s1, %s212_s28  ;;  %p216_p9 = scmp.lt.u32.totalorder %s212_s28, %s337_s1 }
  0x16   :  { %p218_p10 = pnand %p216_p9, %p213_p8 }
  0x18   :  { %221 = shalt.err (!%p218_p10)
}
  0x19   :  { %s222_s6 = scalar_lea.vmem %s290_s15, 512  ;;  %p227_p12 = scmp.lt.s32.totalorder %s290_s15, %s290_s15 }
  0x1a   :  { %p223_p11 = scmp.ne.s32.totalorder %s290_s15, %s222_s6  ;;  %p228_p13 = scmp.lt.s32.totalorder %s222_s6, %s222_s6 }
  0x1c   :  { %p229_p0 = por %p228_p13, %p227_p12 }
  0x1e   :  { %p230_p1 = pnand %p229_p0, %p223_p11 }
  0x20   :  { %233 = shalt.err (!%p230_p1)
}
  0x21   :  { %s264_s0 = smov 128   ;;  %s265_s7 = smov 8  }
  0x22   :  { %32 = dma.hbm_to_vmem [thread:$0]  %s337_s1, 512, %s290_s15, [#allocation6], %s264_s0, %s264_s0, %s265_s7  }
  0x23   :  { %256 = dma.done.wait [#allocation3], 128  }
  0x24   :  { %257 = vsyncadd [#allocation3], 4294967168 }
  0x25   :  { %258 = dma.done.wait [#allocation6], 512  }
  0x26   :  { %259 = vsyncadd [#allocation6], 4294966784  ;;  %v266_v0 = vmov 0.0|0.0   ;;  %vm267_vm0 = vmmov 0   ;;  %v268_v1 = vmov 0.0   ;;  %v42_v2 = vld [vmem:[#allocation5] sm:$0xff] }
  0x27   :  { %176 = vmatprep.subr.bf16.mxu0 %v266_v0  ;;  %173 = vmatprep.mubr.msk.f32.mxu0 %vm267_vm0, %v268_v1  ;;  %v43_v3 = vld [vmem:[#allocation5 + $0x8] sm:$0xff]  ;;  %v44_v4 = vld [vmem:[#allocation5 + $0x10] sm:$0xff]  ;;  %v45_v6 = vld [vmem:[#allocation5 + $0x18] sm:$0xff]  ;;  %vm46_vm1 = vcmask 261120   ;;  %s269_s11 = smov [#allocation7]   ;;  %vm132_vm2 = vcmask 130048  }
  0x28   :  { %v177_v5 = vpack.c.bf16 %v43_v3, %v42_v2  ;;  %v180_v7 = vpack.c.bf16 %v45_v6, %v44_v4  ;;  %v41_v8 = vld [vmem:[#allocation2] sm:$0xff]  ;;  %s148_s12 = sshll.u32 %s269_s11, 4  ;;  %s149_s12 = int_to_ptr.vmem [resolvable:$true] %s148_s12 }
  0x29   :  { %v159_v9 = vld [vmem:[%s338_s2] ss:$0 sm:$0xff]  ;;  %s234_s13 = scalar_lea.vmem %s149_s12, 128  ;;  %p239_p3 = scmp.lt.s32.totalorder %s149_s12, %s149_s12 }
  0x2a   :  { %178 = vmatpush3.bf16.msra.mxu0 %v177_v5  ;;  %p235_p2 = scmp.ne.s32.totalorder %s149_s12, %s234_s13  ;;  %p240_p4 = scmp.lt.s32.totalorder %s234_s13, %s234_s13 }
  0x2b   :  { %179 = vmatprep.subr.bf16.mxu0 %v266_v0 }
  0x2c   :  { %p241_p5 = por %p240_p4, %p239_p3 }
  0x2e   :  { %181 = vmatpush3.bf16.msra.mxu0 %v180_v7  ;;  %p242_p6 = pnand %p241_p5, %p235_p2 }
  0x31   :  { %174 = vmatmul.mubr.msk.f32.vlgmr.msra.gmra.mrb[0].mxu0 %vm46_vm1, %v41_v8 }
 0x104   :  { %v116_v10 = vpop.f32.mrb[0].mxu0 }
 0x105   :  { %v131_v11 = vadd.f32 %v159_v9, %v116_v10  ;;  %v175_v12 = vpop.f32.mrb[1].mxu0 }
 0x107   :  { %133 = vst.msk [vmem:[#allocation7] sm:$0xff] %vm132_vm2, %v131_v11 }
 0x108   :  { %245 = shalt.err (!%p242_p6)
}
 0x109   :  { %s246_s16 = scalar_lea.hbm %s339_s3, 128 }
 0x10a   :  { %p247_p7 = scmp.ne.s32.totalorder %s339_s3, %s246_s16  ;;  %p250_p8 = scmp.lt.u32.totalorder %s246_s16, %s339_s3 }
 0x10c   :  { %p252_p9 = pnand %p250_p8, %p247_p7 }
 0x10e   :  { %255 = shalt.err (!%p252_p9)
}
 0x10f   :  { %151 = dma.vmem_to_hbm [thread:$0]  %s149_s12, 128, %s339_s3, [#allocation4]  }
 0x110   :  { %260 = dma.done.wait [#allocation4], 128  }
 0x111   :  { %261 = vsyncadd [#allocation4], 4294967168 }
 0x112   :  { %155 = vsyncpa [#allocation3], 1 }
 0x113   :  { %156 = vsyncpa [#allocation6], 1 }
 0x114   :  { %157 = vsyncpa [#allocation4], 1 }

</bundles_post_ra>
